<compile_context>
chip_gen: v5e
topology: v5e:2x2
jax: 0.10.0
libtpu: 0.0.40
codegen_flags: <defaults>
</compile_context>

<pallas_src>
import functools

import jax
import jax.numpy as jnp
from jax.experimental import pallas as pl
from jax.experimental.pallas import tpu as pltpu

# SELU constants (match torch.nn.functional.selu)
_SELU_ALPHA = 1.6732632423543772
_SELU_SCALE = 1.0507009873554805

_LANE = 128         # TPU lane width -> lane-dense padding of hidden/output dims
_SUBLANE = 8        # f32 sublane granularity for the batch tile
_MAX_TILE_M = 1024  # batch tile size cap (VMEM: ~1.2 MiB double-buffered, safe everywhere)

# One-time hardware sniff (generation-specific toggles only; safe fallbacks).
try:
    _DEVICE_KIND = jax.devices()[0].device_kind.lower()
except Exception:  # pragma: no cover - e.g. no backend yet
    _DEVICE_KIND = ""
_NUM_TENSORCORES = 2 if "v7" in _DEVICE_KIND else 1
# bf16 EUP/VPU exist on v6e/v7x; v5e (and older) stay in f32 for transcendentals.
_TRANSCENDENTAL_DTYPE = (
    jnp.bfloat16 if ("v6" in _DEVICE_KIND or "v7" in _DEVICE_KIND) else jnp.float32
)


def _round_up(n, m):
    return ((n + m - 1) // m) * m


def _selu(x):
    # Elementwise in x.dtype (bf16 on v6e/v7x, f32 on v5e). exp of large positives
    # in the discarded where-branch is benign (masked by the select).
    return _SELU_SCALE * jnp.where(x > 0, x, _SELU_ALPHA * (jnp.exp(x) - 1.0))


def actor_kernel(x_ref, w1_ref, b1_ref, w2_ref, b2_ref, w3_ref, b3_ref, o_ref, *,
                 act_dtype):
    # Weights arrive pre-cast to bf16 (MXU-native); matmul accumulation and the
    # bias adds are f32; SELU/tanh run in act_dtype (bf16 where the EUP supports it).
    x = x_ref[...].astype(jnp.bfloat16)

    h = jnp.dot(x, w1_ref[...], preferred_element_type=jnp.float32) + b1_ref[...]
    h = _selu(h.astype(act_dtype)).astype(jnp.bfloat16)

    h = jnp.dot(h, w2_ref[...], preferred_element_type=jnp.float32) + b2_ref[...]
    h = _selu(h.astype(act_dtype)).astype(jnp.bfloat16)

    h = jnp.dot(h, w3_ref[...], preferred_element_type=jnp.float32) + b3_ref[...]
    o_ref[...] = jnp.tanh(h.astype(act_dtype)).astype(o_ref.dtype)  # lane-dense bf16 store


def prepare_actor_params(w1, b1, w2, b2, w3, b3):
    """One-time parameter prep (hoisted out of the per-call forward).

    Pads hidden widths and the fc3 output to 128 lanes (zero padding is exact:
    selu(0)=0, tanh(0)=0, and the padded rows/cols contribute nothing), and
    casts weights to bf16 for the MXU. Biases stay f32.
    """
    state_size, fc1_width = w1.shape
    fc2_width = w2.shape[1]
    action_dim = w3.shape[1]

    h1p = _round_up(fc1_width, _LANE)
    h2p = _round_up(fc2_width, _LANE)
    outp = _round_up(action_dim, _LANE)

    w1p = jnp.pad(w1, ((0, 0), (0, h1p - fc1_width))).astype(jnp.bfloat16)
    b1p = jnp.pad(b1, ((0, 0), (0, h1p - fc1_width))).astype(jnp.float32)
    w2p = jnp.pad(w2, ((0, h1p - fc1_width), (0, h2p - fc2_width))).astype(jnp.bfloat16)
    b2p = jnp.pad(b2, ((0, 0), (0, h2p - fc2_width))).astype(jnp.float32)
    w3p = jnp.pad(w3, ((0, h2p - fc2_width), (0, outp - action_dim))).astype(jnp.bfloat16)
    b3p = jnp.pad(b3, ((0, 0), (0, outp - action_dim))).astype(jnp.float32)
    return (w1p, b1p, w2p, b2p, w3p, b3p)


def _choose_tile_m(batch):
    # Fewest tiles at <= _MAX_TILE_M rows (amortize per-grid-step overhead),
    # rounded to the sublane; on multi-TC chips (v7x) split into >=2 grid steps
    # when the batch is big enough so both TensorCores get work.
    num_tiles = pl.cdiv(batch, _MAX_TILE_M)
    if _NUM_TENSORCORES > 1:
        num_tiles = max(num_tiles, min(_NUM_TENSORCORES, pl.cdiv(batch, _SUBLANE)))
    return _round_up(pl.cdiv(batch, num_tiles), _SUBLANE)


@functools.partial(jax.jit, static_argnames=("action_dim",))
def actor_forward(state, params, *, action_dim):
    """Forward pass. `params` must come from prepare_actor_params()."""
    # Mimic PyTorch: promote 1-D state to a batch of one.
    if state.ndim == 1:
        state = state[None, :]
    state = state.astype(jnp.float32)
    batch, state_size = state.shape

    w1, b1, w2, b2, w3, b3 = params
    h1w = w1.shape[1]
    h2w = w2.shape[1]
    outp = w3.shape[1]

    tile_m = _choose_tile_m(batch)
    grid = (pl.cdiv(batch, tile_m),)  # ragged last block handled by the pipeline

    kernel = functools.partial(actor_kernel, act_dtype=_TRANSCENDENTAL_DTYPE)

    out = pl.pallas_call(
        kernel,
        out_shape=jax.ShapeDtypeStruct((batch, outp), jnp.bfloat16),
        grid=grid,
        in_specs=[
            # x: tiled over the batch grid axis
            pl.BlockSpec((tile_m, state_size), lambda i: (i, 0)),
            # weights / biases: constant block index -> VMEM-resident across grid
            pl.BlockSpec((state_size, h1w), lambda i: (0, 0)),
            pl.BlockSpec((1, h1w), lambda i: (0, 0)),
            pl.BlockSpec((h1w, h2w), lambda i: (0, 0)),
            pl.BlockSpec((1, h2w), lambda i: (0, 0)),
            pl.BlockSpec((h2w, outp), lambda i: (0, 0)),
            pl.BlockSpec((1, outp), lambda i: (0, 0)),
        ],
        out_specs=pl.BlockSpec((tile_m, outp), lambda i: (i, 0)),
        compiler_params=pltpu.CompilerParams(
            dimension_semantics=("parallel",)),  # megacore / v7x dual-TC sharding
    )(state, w1, b1, w2, b2, w3, b3)

    # Slice padded lanes back to action_dim and restore f32 to match the reference.
    return out[:, :action_dim].astype(jnp.float32)


def init_actor_params(key, state_size, action_dim, fc1_width, fc2_width):
    """Deterministic parameter init mirroring Actor.reset_parameters bounds.

    weight_init() in the reference uses weight.size()[0] == out_features, so the
    bound for fc1/fc2 weights is 1/sqrt(out_features); fc3 uses (-3e-3, 3e-3).
    Biases use the PyTorch Linear default bound 1/sqrt(in_features).
    """
    ks = jax.random.split(key, 6)

    def u(k, shape, bound):
        return jax.random.uniform(k, shape, jnp.float32, -bound, bound)

    b1w = 1.0 / jnp.sqrt(float(fc1_width))
    b2w = 1.0 / jnp.sqrt(float(fc2_width))
    w1 = u(ks[0], (state_size, fc1_width), b1w)
    b1 = u(ks[1], (1, fc1_width), 1.0 / jnp.sqrt(float(state_size)))
    w2 = u(ks[2], (fc1_width, fc2_width), b2w)
    b2 = u(ks[3], (1, fc2_width), 1.0 / jnp.sqrt(float(fc1_width)))
    w3 = u(ks[4], (fc2_width, action_dim), 0.003)
    b3 = u(ks[5], (1, action_dim), 1.0 / jnp.sqrt(float(fc2_width)))
    return w1, b1, w2, b2, w3, b3


if __name__ == "__main__":
    key = jax.random.PRNGKey(0)
    k_params, k_state = jax.random.split(key)

    state_size, action_dim = 16, 4
    fc1_width, fc2_width = 64, 32
    batch = 2

    raw_params = init_actor_params(k_params, state_size, action_dim, fc1_width, fc2_width)
    prepared = prepare_actor_params(*raw_params)   # one-time weight prep (hoisted)
    prepared = jax.tree_util.tree_map(jax.block_until_ready, prepared)

    state = jax.random.normal(k_state, (batch, state_size), jnp.float32)

    out = actor_forward(state, prepared, action_dim=action_dim)
    jax.block_until_ready(out)

    # Pure-JAX f32 reference check of the fused kernel (bf16 MXU/EUP -> loose atol).
    w1, b1, w2, b2, w3, b3 = raw_params
    h = jax.nn.selu(state @ w1 + b1)
    h = jax.nn.selu(h @ w2 + b2)
    ref = jnp.tanh(h @ w3 + b3)
    assert out.shape == (batch, action_dim)
    assert jnp.allclose(out, ref, atol=2e-2), "mismatch vs reference"

    # 1-D state path (PyTorch-style promotion to a batch of one).
    out1 = actor_forward(state[0], prepared, action_dim=action_dim)
    jax.block_until_ready(out1)
    assert out1.shape == (1, action_dim)
    assert jnp.allclose(out1, ref[:1], atol=2e-2), "mismatch vs reference (1-D path)"

    print("KERNEL_OK")
</pallas_src>

<mosaic_0001>
module attributes {stable_mosaic.version = 11 : i64} {
  func.func @actor_kernel(%arg0: i32, %arg1: memref<8x16xf32, #tpu.memory_space<vmem>>, %arg2: memref<16x128xbf16, #tpu.memory_space<vmem>>, %arg3: memref<1x128xf32, #tpu.memory_space<vmem>>, %arg4: memref<128x128xbf16, #tpu.memory_space<vmem>>, %arg5: memref<1x128xf32, #tpu.memory_space<vmem>>, %arg6: memref<128x128xbf16, #tpu.memory_space<vmem>>, %arg7: memref<1x128xf32, #tpu.memory_space<vmem>>, %arg8: memref<8x128xbf16, #tpu.memory_space<vmem>>) attributes {dimension_semantics = [#tpu.dimension_semantics<parallel>], iteration_bounds = array<i64: 1>, scalar_prefetch = 0 : i64, scratch_operands = 0 : i64, tpu.core_type = #tpu.core_type<tc>, window_params = [{transform_indices = @transform_0, window_bounds = array<i64: 8, 16>}, {pipeline_mode = #tpu.pipeline_mode<synchronous>, transform_indices = @transform_1, window_bounds = array<i64: 16, 128>}, {pipeline_mode = #tpu.pipeline_mode<synchronous>, transform_indices = @transform_2, window_bounds = array<i64: 1, 128>}, {pipeline_mode = #tpu.pipeline_mode<synchronous>, transform_indices = @transform_3, window_bounds = array<i64: 128, 128>}, {pipeline_mode = #tpu.pipeline_mode<synchronous>, transform_indices = @transform_4, window_bounds = array<i64: 1, 128>}, {pipeline_mode = #tpu.pipeline_mode<synchronous>, transform_indices = @transform_5, window_bounds = array<i64: 128, 128>}, {pipeline_mode = #tpu.pipeline_mode<synchronous>, transform_indices = @transform_6, window_bounds = array<i64: 1, 128>}, {transform_indices = @transform_7, window_bounds = array<i64: 8, 128>}]} {
    %c0 = arith.constant 0 : index
    %c0_0 = arith.constant 0 : index
    %0 = vector.load %arg1[%c0, %c0_0] : memref<8x16xf32, #tpu.memory_space<vmem>>, vector<8x16xf32>
    %1 = arith.truncf %0 : vector<8x16xf32> to vector<8x16xbf16>
    %c0_1 = arith.constant 0 : index
    %c0_2 = arith.constant 0 : index
    %2 = vector.load %arg2[%c0_1, %c0_2] : memref<16x128xbf16, #tpu.memory_space<vmem>>, vector<16x128xbf16>
    %cst = arith.constant dense<0.000000e+00> : vector<8x128xf32>
    %3 = tpu.matmul %1, %2, %cst {dimension_numbers = #tpu.dot_dimension_numbers<[1], [0], [0], [1], [0, 0, 1, 1], [], []>} : vector<8x16xbf16>, vector<16x128xbf16>, vector<8x128xf32> -> vector<8x128xf32>
    %c0_3 = arith.constant 0 : index
    %c0_4 = arith.constant 0 : index
    %4 = vector.load %arg3[%c0_3, %c0_4] : memref<1x128xf32, #tpu.memory_space<vmem>>, vector<1x128xf32>
    %5 = vector.broadcast %4 : vector<1x128xf32> to vector<8x128xf32>
    %6 = arith.addf %3, %5 : vector<8x128xf32>
    %cst_5 = arith.constant 0.000000e+00 : f32
    %7 = vector.broadcast %cst_5 : f32 to vector<8x128xf32>
    %8 = arith.cmpf ogt, %6, %7 : vector<8x128xf32>
    %9 = math.exp %6 : vector<8x128xf32>
    %cst_6 = arith.constant 1.000000e+00 : f32
    %10 = vector.broadcast %cst_6 : f32 to vector<8x128xf32>
    %11 = arith.subf %9, %10 : vector<8x128xf32>
    %cst_7 = arith.constant 1.67326319 : f32
    %12 = vector.broadcast %cst_7 : f32 to vector<8x128xf32>
    %13 = arith.mulf %12, %11 : vector<8x128xf32>
    %14 = arith.select %8, %6, %13 : vector<8x128xi1>, vector<8x128xf32>
    %cst_8 = arith.constant 1.05070102 : f32
    %15 = vector.broadcast %cst_8 : f32 to vector<8x128xf32>
    %16 = arith.mulf %15, %14 : vector<8x128xf32>
    %17 = arith.truncf %16 : vector<8x128xf32> to vector<8x128xbf16>
    %c0_9 = arith.constant 0 : index
    %c0_10 = arith.constant 0 : index
    %18 = vector.load %arg4[%c0_9, %c0_10] : memref<128x128xbf16, #tpu.memory_space<vmem>>, vector<128x128xbf16>
    %cst_11 = arith.constant dense<0.000000e+00> : vector<8x128xf32>
    %19 = tpu.matmul %17, %18, %cst_11 {dimension_numbers = #tpu.dot_dimension_numbers<[1], [0], [0], [1], [0, 0, 1, 1], [], []>} : vector<8x128xbf16>, vector<128x128xbf16>, vector<8x128xf32> -> vector<8x128xf32>
    %c0_12 = arith.constant 0 : index
    %c0_13 = arith.constant 0 : index
    %20 = vector.load %arg5[%c0_12, %c0_13] : memref<1x128xf32, #tpu.memory_space<vmem>>, vector<1x128xf32>
    %21 = vector.broadcast %20 : vector<1x128xf32> to vector<8x128xf32>
    %22 = arith.addf %19, %21 : vector<8x128xf32>
    %cst_14 = arith.constant 0.000000e+00 : f32
    %23 = vector.broadcast %cst_14 : f32 to vector<8x128xf32>
    %24 = arith.cmpf ogt, %22, %23 : vector<8x128xf32>
    %25 = math.exp %22 : vector<8x128xf32>
    %cst_15 = arith.constant 1.000000e+00 : f32
    %26 = vector.broadcast %cst_15 : f32 to vector<8x128xf32>
    %27 = arith.subf %25, %26 : vector<8x128xf32>
    %cst_16 = arith.constant 1.67326319 : f32
    %28 = vector.broadcast %cst_16 : f32 to vector<8x128xf32>
    %29 = arith.mulf %28, %27 : vector<8x128xf32>
    %30 = arith.select %24, %22, %29 : vector<8x128xi1>, vector<8x128xf32>
    %cst_17 = arith.constant 1.05070102 : f32
    %31 = vector.broadcast %cst_17 : f32 to vector<8x128xf32>
    %32 = arith.mulf %31, %30 : vector<8x128xf32>
    %33 = arith.truncf %32 : vector<8x128xf32> to vector<8x128xbf16>
    %c0_18 = arith.constant 0 : index
    %c0_19 = arith.constant 0 : index
    %34 = vector.load %arg6[%c0_18, %c0_19] : memref<128x128xbf16, #tpu.memory_space<vmem>>, vector<128x128xbf16>
    %cst_20 = arith.constant dense<0.000000e+00> : vector<8x128xf32>
    %35 = tpu.matmul %33, %34, %cst_20 {dimension_numbers = #tpu.dot_dimension_numbers<[1], [0], [0], [1], [0, 0, 1, 1], [], []>} : vector<8x128xbf16>, vector<128x128xbf16>, vector<8x128xf32> -> vector<8x128xf32>
    %c0_21 = arith.constant 0 : index
    %c0_22 = arith.constant 0 : index
    %36 = vector.load %arg7[%c0_21, %c0_22] : memref<1x128xf32, #tpu.memory_space<vmem>>, vector<1x128xf32>
    %37 = vector.broadcast %36 : vector<1x128xf32> to vector<8x128xf32>
    %38 = arith.addf %35, %37 : vector<8x128xf32>
    %39 = math.tanh %38 : vector<8x128xf32>
    %40 = arith.truncf %39 : vector<8x128xf32> to vector<8x128xbf16>
    %c0_23 = arith.constant 0 : index
    %c0_24 = arith.constant 0 : index
    %41 = vector.load %arg8[%c0_23, %c0_24] : memref<8x128xbf16, #tpu.memory_space<vmem>>, vector<8x128xbf16>
    tpu.vector_store %arg8[%c0_23, %c0_24], %40 {strides = array<i32>} : memref<8x128xbf16, #tpu.memory_space<vmem>>, vector<8x128xbf16>,
    return
  }
  func.func @transform_0(%arg0: i32) -> (i32, i32) {
    %c0_i32 = arith.constant 0 : i32
    %c0_i32_0 = arith.constant 0 : i32
    return %arg0, %c0_i32 : i32, i32
  }
  func.func @transform_1(%arg0: i32) -> (i32, i32) {
    %c0_i32 = arith.constant 0 : i32
    %c0_i32_0 = arith.constant 0 : i32
    %c0_i32_1 = arith.constant 0 : i32
    return %c0_i32, %c0_i32_0 : i32, i32
  }
  func.func @transform_2(%arg0: i32) -> (i32, i32) {
    %c0_i32 = arith.constant 0 : i32
    %c0_i32_0 = arith.constant 0 : i32
    %c0_i32_1 = arith.constant 0 : i32
    return %c0_i32, %c0_i32_0 : i32, i32
  }
  func.func @transform_3(%arg0: i32) -> (i32, i32) {
    %c0_i32 = arith.constant 0 : i32
    %c0_i32_0 = arith.constant 0 : i32
    %c0_i32_1 = arith.constant 0 : i32
    return %c0_i32, %c0_i32_0 : i32, i32
  }
  func.func @transform_4(%arg0: i32) -> (i32, i32) {
    %c0_i32 = arith.constant 0 : i32
    %c0_i32_0 = arith.constant 0 : i32
    %c0_i32_1 = arith.constant 0 : i32
    return %c0_i32, %c0_i32_0 : i32, i32
  }
  func.func @transform_5(%arg0: i32) -> (i32, i32) {
    %c0_i32 = arith.constant 0 : i32
    %c0_i32_0 = arith.constant 0 : i32
    %c0_i32_1 = arith.constant 0 : i32
    return %c0_i32, %c0_i32_0 : i32, i32
  }
  func.func @transform_6(%arg0: i32) -> (i32, i32) {
    %c0_i32 = arith.constant 0 : i32
    %c0_i32_0 = arith.constant 0 : i32
    %c0_i32_1 = arith.constant 0 : i32
    return %c0_i32, %c0_i32_0 : i32, i32
  }
  func.func @transform_7(%arg0: i32) -> (i32, i32) {
    %c0_i32 = arith.constant 0 : i32
    %c0_i32_0 = arith.constant 0 : i32
    return %arg0, %c0_i32 : i32, i32
  }
}

</mosaic_0001>

<bundles_post_ra>
// kernel: actor_forward.1
= control target key start
LH: loop header
LB: loop body
LE: loop exit
PB: predicated region body
PF: predicated region fallthrough
CT: control target
= control target key end

     0   :  { %12 = vsyncpa [#allocation3], 0  ;;  %s650_s0 = inlined_call_operand.hbm [shape: f32[2,16], index: 0, kind: input, shape index: {}]   ;;  %s651_s1 = inlined_call_operand.hbm [shape: bf16[16,128], index: 1, kind: input, shape index: {}]   ;;  %s652_s2 = inlined_call_operand.vmem [shape: f32[1,128], index: 2, kind: input, shape index: {}]   ;;  %s653_s3 = inlined_call_operand.hbm [shape: bf16[128,128], index: 3, kind: input, shape index: {}]   ;;  %s654_s4 = inlined_call_operand.vmem [shape: f32[1,128], index: 4, kind: input, shape index: {}]   ;;  %s655_s5 = inlined_call_operand.hbm [shape: bf16[128,128], index: 5, kind: input, shape index: {}]   ;;  %s656_s6 = inlined_call_operand.vmem [shape: f32[1,128], index: 6, kind: input, shape index: {}]   ;;  %s657_s7 = inlined_call_operand.vmem [shape: bf16[2,128], index: 7, kind: output, shape index: {}]  }
   0x1   :  { %13 = vsyncpa [#allocation5], 0 }
   0x2   :  { %14 = vsyncpa [#allocation8], 0  ;;  %s32_s26 = sshll.u32 %s651_s1, 4  ;;  %s33_s26 = int_to_ptr.hbm [resolvable:$true] %s32_s26 }
   0x3   :  { %18 = vsyncadd [#allocation3], 96  ;;  %s578_s27 = smov [#allocation4]   ;;  %s19_s8 = sshll.u32 %s650_s0, 4  ;;  %s20_s8 = int_to_ptr.hbm [resolvable:$true] %s19_s8 }
   0x4   :  { %s34_s28 = sshll.u32 %s578_s27, 4  ;;  %s579_s9 = smov 64   ;;  %s35_s28 = int_to_ptr.vmem [resolvable:$true] %s34_s28 }
   0x5   :  { %s580_s10 = smov 4   ;;  %s581_s11 = smov [#allocation2]  }
   0x6   :  { %40 = dma.hbm_to_vmem [thread:$0]  %s33_s26, 128, %s35_s28, [#allocation5], %s579_s9, %s579_s9, %s580_s10  }
   0x7   :  { %s21_s12 = sshll.u32 %s581_s11, 4  ;;  %s582_s13 = smov 32   ;;  %s22_s12 = int_to_ptr.vmem [resolvable:$true] %s21_s12 }
   0x8   :  { %s583_s14 = smov 2   ;;  %s47_s16 = sshll.u32 %s653_s3, 4  ;;  %s48_s16 = int_to_ptr.hbm [resolvable:$true] %s47_s16 }
   0x9   :  { %27 = dma.hbm_to_vmem [thread:$0]  %s20_s8, 32, %s22_s12, [#allocation3], %s582_s13, %s582_s13, %s583_s14  }
   0xa   :  { %s584_s17 = smov [#allocation6]   ;;  %s62_s20 = sshll.u32 %s655_s5, 4  ;;  %s63_s20 = int_to_ptr.hbm [resolvable:$true] %s62_s20 }
   0xb   :  { %s49_s18 = sshll.u32 %s584_s17, 4  ;;  %s585_s21 = smov [#allocation7]   ;;  %s50_s18 = int_to_ptr.vmem [resolvable:$true] %s49_s18 }
   0xc   :  { %55 = dma.hbm_to_vmem [thread:$0]  %s48_s16, 1024, %s50_s18, [#allocation5], %s579_s9, %s579_s9, %s580_s10  }
   0xd   :  { %s64_s22 = sshll.u32 %s585_s21, 4  ;;  %s65_s22 = int_to_ptr.vmem [resolvable:$true] %s64_s22 }
   0xe   :  { %70 = dma.hbm_to_vmem [thread:$0]  %s63_s20, 1024, %s65_s22, [#allocation8], %s579_s9, %s579_s9, %s580_s10  }
   0xf   :  { %572 = dma.done.wait [#allocation3], 128  }
  0x10   :  { %573 = vsyncadd [#allocation3], 4294967168 }
  0x11   :  { %574 = dma.done.wait [#allocation5], 1152  }
  0x12   :  { %575 = vsyncadd [#allocation5], 4294966144 }
  0x13   :  { %576 = dma.done.wait [#allocation8], 1024  }
  0x14   :  { %577 = vsyncadd [#allocation8], 4294966272  ;;  %v442_v0 = vld [vmem:[#allocation4] sm:$0xff]  ;;  %v90_v1 = vld [vmem:[#allocation2] sm:$0xff]  ;;  %vm104_vm0 = vcmask 130048   ;;  %vm303_vm3 = vcmask 1040384  }
  0x15   :  { %v450_v2 = vld [vmem:[#allocation6 + $0x38] sm:$0xff]  ;;  %v91_v3 = vpack.c.bf16 %v90_v1, %v90_v1  ;;  %115 = vmatpush.bf16.msra.mxu0 %v442_v0  ;;  %v449_v4 = vld [vmem:[#allocation6 + $0x30] sm:$0xff]  ;;  %v448_v5 = vld [vmem:[#allocation6 + $0x28] sm:$0xff] }
  0x16   :  { %197 = vmatpush.bf16.msra.mxu1 %v450_v2  ;;  %v447_v6 = vld [vmem:[#allocation6 + $0x20] sm:$0xff]  ;;  %v446_v7 = vld [vmem:[#allocation6 + $0x18] sm:$0xff]  ;;  %v445_v8 = vld [vmem:[#allocation6 + $0x10] sm:$0xff] }
  0x17   :  { %v444_v9 = vld [vmem:[#allocation6 + $0x8] sm:$0xff]  ;;  %v443_v10 = vld [vmem:[#allocation6] sm:$0xff]  ;;  %v458_v11 = vld [vmem:[#allocation7 + $0x38] sm:$0xff] }
  0x18   :  { %375 = vmatmul.msk.bf16.vlgmr.msra.gmra.mxu0 %vm104_vm0, %v91_v3  ;;  %286 = vmatpush.bf16.msra.mxu2 %v458_v11  ;;  %v457_v12 = vld [vmem:[#allocation7 + $0x30] sm:$0xff]  ;;  %v456_v13 = vld [vmem:[#allocation7 + $0x28] sm:$0xff]  ;;  %v455_v25 = vld [vmem:[#allocation7 + $0x20] sm:$0xff] }
  0x19   :  { %v467_v14 = vld [vmem:[%s652_s2] ss:$0 sm:$0xff]  ;;  %v454_v26 = vld [vmem:[#allocation7 + $0x18] sm:$0xff]  ;;  %v452_v28 = vld [vmem:[#allocation7 + $0x8] sm:$0xff] }
  0x1a   :  { %198 = vmatpush.bf16.msra.mxu1 %v449_v4  ;;  %v453_v27 = vld [vmem:[#allocation7 + $0x10] sm:$0xff]  ;;  %v451_v29 = vld [vmem:[#allocation7] sm:$0xff] }
  0x1b   :  { %v468_v30 = vld [vmem:[%s654_s4] ss:$0 sm:$0xff] }
  0x1c   :  { %287 = vmatpush.bf16.msra.mxu2 %v457_v12  ;;  %v469_v41 = vld [vmem:[%s656_s6] ss:$0 sm:$0xff] }
  0x1e   :  { %199 = vmatpush.bf16.msra.mxu1 %v448_v5 }
  0x20   :  { %288 = vmatpush.bf16.msra.mxu2 %v456_v13 }
  0x22   :  { %200 = vmatpush.bf16.msra.mxu1 %v447_v6 }
  0x24   :  { %289 = vmatpush.bf16.msra.mxu2 %v455_v25 }
  0x26   :  { %201 = vmatpush.bf16.msra.mxu1 %v446_v7 }
  0x28   :  { %290 = vmatpush.bf16.msra.mxu2 %v454_v26 }
  0x2a   :  { %202 = vmatpush.bf16.msra.mxu1 %v445_v8 }
  0x2c   :  { %291 = vmatpush.bf16.msra.mxu2 %v453_v27 }
  0x2e   :  { %203 = vmatpush.bf16.msra.mxu1 %v444_v9 }
  0x30   :  { %292 = vmatpush.bf16.msra.mxu2 %v452_v28 }
  0x32   :  { %204 = vmatpush.bf16.msra.mxu1 %v443_v10 }
  0x34   :  { %293 = vmatpush.bf16.msra.mxu2 %v451_v29 }
  0x95   :  { %v117_v15 = vpop.f32.mrf.mxu0 }
  0x96   :  { %v118_v16 = vadd.f32 %v467_v14, %v117_v15 }
  0x98   :  { %v122_v17 = vmul.f32 1.442695, %v118_v16  ;;  %vm121_vm1 = vcmp.gt.f32.partialorder %v118_v16, 0.0 }
  0x9a   :  { %470 = vpow2.f32 %v122_v17 }
  0x9d   :  { %v119_v18 = vpop.f32.mrf.mxu0 }
  0xa0   :  { %v471_v19 = vpop.eup %470 }
  0xa1   :  { %v376_v20 = vadd.f32 -1.0, %v471_v19 }
  0xa3   :  { %v125_v21 = vmul.f32 1.6732632, %v376_v20 }
  0xa5   :  { %v126_v22 = vsel %vm121_vm1, %v118_v16, %v125_v21 }
  0xa6   :  { %v127_v23 = vmul.f32 1.050701, %v126_v22 }
  0xa8   :  { %v128_v24 = vpack.c.bf16 %v127_v23, %v127_v23 }
  0xaa   :  { %205 = vmatmul.bf16.vlgmr.msra.gmra.mxu1 %v128_v24 }
 0x127   :  { %v206_v31 = vpop.f32.mrf.mxu1 }
 0x128   :  { %v207_v32 = vadd.f32 %v468_v30, %v206_v31 }
 0x12a   :  { %v211_v33 = vmul.f32 1.442695, %v207_v32  ;;  %vm210_vm2 = vcmp.gt.f32.partialorder %v207_v32, 0.0 }
 0x12c   :  { %472 = vpow2.f32 %v211_v33 }
 0x12f   :  { %v208_v34 = vpop.f32.mrf.mxu1 }
 0x132   :  { %v473_v35 = vpop.eup %472 }
 0x133   :  { %v409_v36 = vadd.f32 -1.0, %v473_v35 }
 0x135   :  { %v214_v37 = vmul.f32 1.6732632, %v409_v36 }
 0x137   :  { %v215_v38 = vsel %vm210_vm2, %v207_v32, %v214_v37 }
 0x138   :  { %v216_v39 = vmul.f32 1.050701, %v215_v38 }
 0x13a   :  { %v217_v40 = vpack.c.bf16 %v216_v39, %v216_v39 }
 0x13c   :  { %294 = vmatmul.bf16.vlgmr.msra.gmra.mxu2 %v217_v40 }
 0x1bf   :  { %v295_v42 = vpop.f32.mrf.mxu2 }
 0x1c0   :  { %v296_v43 = vadd.f32 %v469_v41, %v295_v42 }
 0x1c2   :  { %474 = vtanh.f32 %v296_v43 }
 0x1c7   :  { %v297_v44 = vpop.f32.mrf.mxu2 }
 0x1c8   :  { %v475_v45 = vpop.eup %474 }
 0x1c9   :  { %v300_v46 = vpack.c.bf16 %v475_v45, %v475_v45 }
 0x1cb   :  { %v302_v47 = vrot.slane %v300_v46, 3 }
 0x1cd   :  { %v306_v48 = vsel %vm303_vm3, %v300_v46, %v302_v47 }
 0x1ce   :  { %323 = vst [vmem:[#allocation9] sm:$0x1] %v306_v48 }
 0x1d5   :  { %v345_v49 = vld [vmem:[#allocation9] sm:$0x1] }
 0x1d6   :  { %346 = vst [vmem:[%s657_s7] sm:$0x1] %v345_v49 }
 0x1d7   :  { %364 = vsyncpa [#allocation3], 1 }
 0x1d8   :  { %365 = vsyncpa [#allocation5], 1 }
 0x1d9   :  { %366 = vsyncpa [#allocation8], 1 }

</bundles_post_ra>
